<compile_context>
chip_gen: v7x
topology: tpu7x:2x2x1
jax: 0.10.0
libtpu: 0.0.40
codegen_flags: <defaults>
</compile_context>

<pallas_src>
import jax
import jax.numpy as jnp
from jax.experimental import pallas as pl
from jax.experimental.pallas import tpu as pltpu

_MIB = 2 ** 20


def _regression_kernel(w_ref, b_ref, x_ref, o_ref):
    # w_ref / b_ref are (1,) float32 scalars in SMEM; x_ref / o_ref are VMEM tiles.
    w = w_ref[0]
    b = b_ref[0]
    # Compute in float32 (mirrors torch promotion), cast only the output.
    o_ref[...] = (x_ref[...].astype(jnp.float32) * w + b).astype(o_ref.dtype)


def _round_up(a, m):
    return ((a + m - 1) // m) * m


def _sublane_multiple(itemsize):
    # Packed-tile second-minor multiples: f32 -> 8, bf16/f16 -> 16, int8/fp8 -> 32.
    return {4: 8, 2: 16, 1: 32}.get(int(itemsize), 8)


def regression_forward(x, w, b, *, lane_width=1024, target_tile_bytes=4 * _MIB):
    """y = w * x + b with scalar w, b (mirrors torch RegressionModel.forward).

    Accepts x of any rank/shape.  Uses zero-copy lane-dense views whenever
    possible; falls back to pad + slice only for awkward shapes.
    """
    x = jnp.asarray(x)
    w_arr = jnp.asarray(w).reshape(-1)
    b_arr = jnp.asarray(b).reshape(-1)

    orig_shape = x.shape
    out_dtype = jnp.result_type(x.dtype, w_arr.dtype)
    total = int(x.size)
    if total == 0:
        return jnp.zeros(orig_shape, out_dtype)

    x_itemsize = jnp.dtype(x.dtype).itemsize
    out_itemsize = jnp.dtype(out_dtype).itemsize

    C0 = int(lane_width)
    assert C0 % 128 == 0

    # ---- Choose a lane-dense 2-D view of x (zero-copy whenever possible) ----
    if total % C0 == 0:
        # (a) exact multiple of the preferred lane width: free reshape.
        rows, C = total // C0, C0
        x2 = x.reshape(rows, C)
        padded = False
    elif orig_shape and orig_shape[-1] % 128 == 0:
        # (b) last dim already lane-aligned: collapse leading dims, no copy.
        C = int(orig_shape[-1])
        rows = total // C
        x2 = x.reshape(rows, C)
        padded = False
    else:
        # (c) fallback: pad the flattened tensor up to a full (rows, C0) slab.
        # TODO(synk): for huge awkward tensors, run the multiple-of-C prefix
        # pad-free and only pad the small remainder.
        C = C0
        rows = -(-total // C)
        xf = x.reshape(-1)
        pad = rows * C - total
        if pad:
            xf = jnp.pad(xf, (0, pad))
        x2 = xf.reshape(rows, C)
        padded = True

    # ---- Tile sizing ---------------------------------------------------------
    sub = max(_sublane_multiple(x_itemsize), _sublane_multiple(out_itemsize))

    try:
        vmem_cap = int(pltpu.get_tpu_info().vmem_capacity_bytes)
    except Exception:
        vmem_cap = 64 * _MIB  # conservative (v7x-sized) fallback
    hard_cap = max(16 * _MIB, vmem_cap - 16 * _MIB)  # leave Mosaic scratch headroom

    per_row_bytes = C * (x_itemsize + out_itemsize)
    if rows <= sub:
        tile_rows = rows  # block == full array dims: exact, single step
    else:
        tile_rows = max(sub, (target_tile_bytes // (C * out_itemsize)) // sub * sub)
        # Keep the double-buffered (in + out) working set under the VMEM cap.
        max_rows_by_vmem = max(
            sub, ((hard_cap - 8 * _MIB) // (2 * per_row_bytes)) // sub * sub
        )
        tile_rows = min(tile_rows, max_rows_by_vmem)
        rows_r = _round_up(rows, sub)
        if tile_rows >= rows_r:
            # Would collapse to one grid step; split in two so v7x's second
            # TensorCore has work (no effect on single-core v5e/v6e).
            tile_rows = _round_up(-(-rows_r // 2), sub)
        tile_rows = min(tile_rows, rows_r)

    grid = (pl.cdiv(rows, tile_rows),)

    in_tile = tile_rows * C * x_itemsize
    out_tile = tile_rows * C * out_itemsize
    vmem_limit = int(min(hard_cap, max(32 * _MIB, 2 * (in_tile + out_tile) + 4 * _MIB)))

    cost = pl.CostEstimate(
        flops=2 * rows * C,
        transcendentals=0,
        bytes_accessed=rows * C * (x_itemsize + out_itemsize),
    )

    w32 = w_arr[:1].astype(jnp.float32)
    b32 = b_arr[:1].astype(jnp.float32)

    out = pl.pallas_call(
        _regression_kernel,
        out_shape=jax.ShapeDtypeStruct((rows, C), out_dtype),
        grid=grid,
        in_specs=[
            pl.BlockSpec(memory_space=pltpu.SMEM),            # w (scalar)
            pl.BlockSpec(memory_space=pltpu.SMEM),            # b (scalar)
            pl.BlockSpec((tile_rows, C), lambda i: (i, 0)),   # x tile
        ],
        out_specs=pl.BlockSpec((tile_rows, C), lambda i: (i, 0)),
        compiler_params=pltpu.CompilerParams(
            dimension_semantics=("parallel",),
            vmem_limit_bytes=vmem_limit,
        ),
        cost_estimate=cost,
    )(w32, b32, x2)

    if padded:
        return out.reshape(-1)[:total].reshape(orig_shape)
    return out.reshape(orig_shape)


if __name__ == "__main__":
    key = jax.random.PRNGKey(0)
    kx1, kx2, kx3, kx4, kx5, kx6, kw, kb = jax.random.split(key, 8)

    # torch.rand([1]) analogs.
    w = jax.random.uniform(kw, (1,), dtype=jnp.float32)
    b = jax.random.uniform(kb, (1,), dtype=jnp.float32)

    x1 = jax.random.normal(kx1, (2, 4, 16, 16), dtype=jnp.float32)   # zero-copy path (a)
    x2 = jax.random.normal(kx2, (8, 128), dtype=jnp.float32)         # zero-copy path (a)
    x3 = jax.random.normal(kx3, (3, 5, 7), dtype=jnp.float32)        # awkward -> pad fallback
    x4 = jax.random.normal(kx4, (256, 1024), dtype=jnp.float32)      # multi-step parallel grid
    x5 = jax.random.normal(kx5, (5, 384), dtype=jnp.float32)         # zero-copy path (b)
    x6 = jax.random.normal(kx6, (64, 256), dtype=jnp.bfloat16)       # f32 promotion, bf16 input

    for xi in (x1, x2, x3, x4, x5, x6):
        yi = jax.block_until_ready(regression_forward(xi, w, b))
        ref = w[0] * xi + b[0]
        assert yi.shape == ref.shape, (yi.shape, ref.shape)
        assert yi.dtype == ref.dtype, (yi.dtype, ref.dtype)
        assert jnp.allclose(yi, ref, atol=1e-6, rtol=1e-6)

    print("KERNEL_OK")
</pallas_src>

<mosaic_0001>
module attributes {stable_mosaic.version = 11 : i64} {
  func.func @_regression_kernel(%arg0: i32, %arg1: memref<1xf32, #tpu.memory_space<smem>>, %arg2: memref<1xf32, #tpu.memory_space<smem>>, %arg3: memref<2x1024xf32, #tpu.memory_space<vmem>>, %arg4: memref<2x1024xf32, #tpu.memory_space<vmem>>) attributes {dimension_semantics = [#tpu.dimension_semantics<parallel>], iteration_bounds = array<i64: 1>, scalar_prefetch = 0 : i64, scratch_operands = 0 : i64, tpu.core_type = #tpu.core_type<tc>, window_params = [{transform_indices = @transform_0, window_bounds = array<i64: 1>}, {transform_indices = @transform_1, window_bounds = array<i64: 1>}, {transform_indices = @transform_2, window_bounds = array<i64: 2, 1024>}, {transform_indices = @transform_3, window_bounds = array<i64: 2, 1024>}]} {
    %c0 = arith.constant 0 : index
    %0 = memref.load %arg1[%c0] : memref<1xf32, #tpu.memory_space<smem>>
    %c0_0 = arith.constant 0 : index
    %1 = memref.load %arg2[%c0_0] : memref<1xf32, #tpu.memory_space<smem>>
    %c0_1 = arith.constant 0 : index
    %c0_2 = arith.constant 0 : index
    %2 = vector.load %arg3[%c0_1, %c0_2] : memref<2x1024xf32, #tpu.memory_space<vmem>>, vector<2x1024xf32>
    %3 = vector.broadcast %0 : f32 to vector<2x1024xf32>
    %4 = arith.mulf %2, %3 : vector<2x1024xf32>
    %5 = vector.broadcast %1 : f32 to vector<2x1024xf32>
    %6 = arith.addf %4, %5 : vector<2x1024xf32>
    %c0_3 = arith.constant 0 : index
    %c0_4 = arith.constant 0 : index
    %7 = vector.load %arg4[%c0_3, %c0_4] : memref<2x1024xf32, #tpu.memory_space<vmem>>, vector<2x1024xf32>
    tpu.vector_store %arg4[%c0_3, %c0_4], %6 {strides = array<i32>} : memref<2x1024xf32, #tpu.memory_space<vmem>>, vector<2x1024xf32>,
    return
  }
  func.func @transform_0(%arg0: i32) -> i32 {
    %c0_i32 = arith.constant 0 : i32
    %c0_i32_0 = arith.constant 0 : i32
    return %c0_i32 : i32
  }
  func.func @transform_1(%arg0: i32) -> i32 {
    %c0_i32 = arith.constant 0 : i32
    %c0_i32_0 = arith.constant 0 : i32
    return %c0_i32 : i32
  }
  func.func @transform_2(%arg0: i32) -> (i32, i32) {
    %c0_i32 = arith.constant 0 : i32
    %c0_i32_0 = arith.constant 0 : i32
    return %arg0, %c0_i32 : i32, i32
  }
  func.func @transform_3(%arg0: i32) -> (i32, i32) {
    %c0_i32 = arith.constant 0 : i32
    %c0_i32_0 = arith.constant 0 : i32
    return %arg0, %c0_i32 : i32, i32
  }
}

</mosaic_0001>

<bundles_post_ra>
// kernel: tpu_custom_call.1
= control target key start
LH: loop header
LB: loop body
LE: loop exit
PB: predicated region body
PF: predicated region fallthrough
CT: control target
= control target key end

     0   :  { %10 = vsyncpa [#allocation5], 0  ;;  %s158_s0 = inlined_call_operand.<no memory space> [shape: f32[1], index: 0, kind: input, shape index: {}]   ;;  %s159_s1 = inlined_call_operand.<no memory space> [shape: f32[1], index: 1, kind: input, shape index: {}]   ;;  %s160_s2 = inlined_call_operand.hbm [shape: f32[2,1024], index: 2, kind: input, shape index: {}]   ;;  %s161_s3 = inlined_call_operand.hbm [shape: f32[2,1024], index: 3, kind: output, shape index: {}]  }
   0x1   :  { %11 = vsyncpa [#allocation6], 0  ;;  %s106_s12 = smov [#allocation4]   ;;  %s58_s16 = scalar_lea.hbm %s160_s2, 256 }
   0x2   :  { %s22_s13 = sshll.u32 %s106_s12, 4  ;;  %p59_p0 = scmp.ne.s32.totalorder %s160_s2, %s58_s16  ;;  %s23_s13 = int_to_ptr.vmem [resolvable:$true] %s22_s13 }
   0x3   :  { %p62_p1 = scmp.lt.u32.totalorder %s58_s16, %s160_s2 }
   0x5   :  { %p64_p2 = pnand %p62_p1, %p59_p0 }
   0x7   :  { %67 = shalt.err (!%p64_p2)
}
   0x8   :  { %s68_s21 = scalar_lea.vmem %s23_s13, 256  ;;  %p73_p4 = scmp.lt.s32.totalorder %s23_s13, %s23_s13 }
   0x9   :  { %p69_p3 = scmp.ne.s32.totalorder %s23_s13, %s68_s21  ;;  %p74_p5 = scmp.lt.s32.totalorder %s68_s21, %s68_s21 }
   0xb   :  { %p75_p6 = por %p74_p5, %p73_p4 }
   0xd   :  { %p76_p7 = pnand %p75_p6, %p69_p3 }
   0xf   :  { %79 = shalt.err (!%p76_p7)
}
  0x10   :  { %25 = dma.hbm_to_vmem [thread:$0]  %s160_s2, 256, %s23_s13, [#allocation5]  }
  0x11   :  { %102 = dma.done.wait [#allocation5], 256  }
  0x12   :  { %103 = vsyncadd [#allocation5], 4294967040  ;;  %v33_v0 = vstv %s158_s0  ;;  %v31_v1 = vld [vmem:[#allocation4] sm:$0xff]  ;;  %v36_v2 = vstv %s159_s1  ;;  %v32_v3 = vld [vmem:[#allocation4 + $0x8] sm:$0xff]  ;;  %s107_s28 = smov [#allocation7]  }
  0x13   :  { %s47_s29 = sshll.u32 %s107_s28, 4  ;;  %v34_v4 = vmul.f32 %v33_v0, %v31_v1  ;;  %v35_v5 = vmul.f32 %v33_v0, %v32_v3  ;;  %s48_s29 = int_to_ptr.vmem [resolvable:$true] %s47_s29 }
  0x14   :  { %s80_s2 = scalar_lea.vmem %s48_s29, 256  ;;  %p85_p9 = scmp.lt.s32.totalorder %s48_s29, %s48_s29 }
  0x15   :  { %v37_v6 = vadd.f32 %v36_v2, %v34_v4  ;;  %v38_v7 = vadd.f32 %v36_v2, %v35_v5  ;;  %p81_p8 = scmp.ne.s32.totalorder %s48_s29, %s80_s2  ;;  %p86_p10 = scmp.lt.s32.totalorder %s80_s2, %s80_s2 }
  0x17   :  { %39 = vst [vmem:[#allocation7] sm:$0xff] %v37_v6  ;;  %40 = vst [vmem:[#allocation7 + $0x8] sm:$0xff] %v38_v7  ;;  %p87_p11 = por %p86_p10, %p85_p9 }
  0x19   :  { %p88_p12 = pnand %p87_p11, %p81_p8 }
  0x1b   :  { %91 = shalt.err (!%p88_p12)
}
  0x1c   :  { %s92_s1 = scalar_lea.hbm %s161_s3, 256 }
  0x1d   :  { %p93_p13 = scmp.ne.s32.totalorder %s161_s3, %s92_s1  ;;  %p96_p0 = scmp.lt.u32.totalorder %s92_s1, %s161_s3 }
  0x1f   :  { %p98_p1 = pnand %p96_p0, %p93_p13 }
  0x21   :  { %101 = shalt.err (!%p98_p1)
}
  0x22   :  { %50 = dma.vmem_to_hbm [thread:$0]  %s48_s29, 256, %s161_s3, [#allocation6]  }
  0x23   :  { %104 = dma.done.wait [#allocation6], 256  }
  0x24   :  { %105 = vsyncadd [#allocation6], 4294967040 }
  0x25   :  { %54 = vsyncpa [#allocation5], 1 }
  0x26   :  { %55 = vsyncpa [#allocation6], 1 }

</bundles_post_ra>
